<compile_context>
chip_gen: v6e
topology: v6e:2x2x1
jax: 0.10.0
libtpu: 0.0.40
codegen_flags: <defaults>
</compile_context>

<pallas_src>
import functools

import jax
import jax.numpy as jnp
from jax.experimental import pallas as pl
from jax.experimental.pallas import tpu as pltpu


def lstm_tagger_kernel(
    x_ref, w_ih_ref, w_hh_ref, b_ref, w_out_ref, b_out_ref, out_ref,
    *, seq_len, batch
):
    """Full LSTM recurrence + final Linear + Sigmoid in one kernel.

    x_ref:     (T*Bp, E)  f32  VMEM  (pre-flattened, Bp = batch padded to mult of 8)
    w_ih_ref:  (E, 4H)    f32  (transposed weight_ih_l0; g columns pre-scaled by 2)
    w_hh_ref:  (H, 4H)    f32  (transposed weight_hh_l0; g columns pre-scaled by 2)
    b_ref:     (1, 4H)    f32  (b_ih + b_hh; g columns pre-scaled by 2)
    w_out_ref: (H, Tp)    f32  (transposed hidden2tag.weight, lane-padded to Tp)
    b_out_ref: (1, Tp)    f32
    out_ref:   (Bp, Tp)   f32
    """
    hidden = w_hh_ref.shape[0]

    # Hoisted input projection: ONE (T*Bp, E) x (E, 4H) MXU matmul + bias fold.
    gates_x = (
        jnp.dot(x_ref[...], w_ih_ref[...], preferred_element_type=jnp.float32)
        + b_ref[...]
    )  # (T*Bp, 4H)

    w_hh = w_hh_ref[...]

    h = jnp.zeros((batch, hidden), jnp.float32)
    c = jnp.zeros((batch, hidden), jnp.float32)

    # Fully unrolled recurrence (T=8 is static and small): only h @ W_hh plus
    # elementwise work on the serial path. PyTorch gate order along 4H: i, f, g, o.
    for t in range(seq_len):
        gates = gates_x[t * batch:(t + 1) * batch, :] + jnp.dot(
            h, w_hh, preferred_element_type=jnp.float32
        )  # (Bp, 4H); g columns already hold 2*g_pre

        sig = jax.nn.sigmoid(gates)                       # EUP push #1 (full vreg)
        i_g = sig[:, 0 * hidden:1 * hidden]
        f_g = sig[:, 1 * hidden:2 * hidden]
        g_g = 2.0 * sig[:, 2 * hidden:3 * hidden] - 1.0   # tanh(x)=2*sigmoid(2x)-1, VPU only
        o_g = sig[:, 3 * hidden:4 * hidden]

        c = f_g * c + i_g * g_g
        h = o_g * jnp.tanh(c)                             # EUP push #2

    # Final Linear (lane-padded to Tp) + Sigmoid; padded rows/lanes sliced off in wrapper.
    logits = jnp.dot(h, w_out_ref[...], preferred_element_type=jnp.float32) + b_out_ref[...]
    out_ref[...] = jax.nn.sigmoid(logits)


def prepare_lstm_tagger_params(w_ih, w_hh, b_ih, b_hh, w_out, b_out):
    """One-time (model-init) parameter layout prep. NOT per-call.

    w_ih: (4H, E), w_hh: (4H, H), b_ih/b_hh: (4H,)  -- PyTorch nn.LSTM shapes
    w_out: (Tag, H), b_out: (Tag,)                  -- PyTorch nn.Linear shapes
    Returns pre-transposed / pre-padded / g-prescaled device arrays for the kernel.
    """
    four_h = w_ih.shape[0]
    hidden = four_h // 4
    tagset_size = w_out.shape[0]

    w_ih_t = jnp.asarray(w_ih, jnp.float32).T                                      # (E, 4H)
    w_hh_t = jnp.asarray(w_hh, jnp.float32).T                                      # (H, 4H)
    b = (jnp.asarray(b_ih, jnp.float32) + jnp.asarray(b_hh, jnp.float32))[None, :]  # (1, 4H)

    # Pre-scale the g gate columns by 2 so the kernel can use tanh(x)=2*sigmoid(2x)-1.
    g_scale = jnp.ones((1, four_h), jnp.float32).at[:, 2 * hidden:3 * hidden].set(2.0)
    w_ih_t = w_ih_t * g_scale
    w_hh_t = w_hh_t * g_scale
    b = b * g_scale

    # Pad tagset to 128 lanes so the output store is lane-dense (unmasked vst).
    t_pad = max(128, ((tagset_size + 127) // 128) * 128)
    w_out_t = (
        jnp.zeros((hidden, t_pad), jnp.float32)
        .at[:, :tagset_size]
        .set(jnp.asarray(w_out, jnp.float32).T)
    )                                                                              # (H, Tp)
    b_out2 = (
        jnp.zeros((1, t_pad), jnp.float32)
        .at[:, :tagset_size]
        .set(jnp.asarray(b_out, jnp.float32)[None, :])
    )                                                                              # (1, Tp)

    return (w_ih_t, w_hh_t, b, w_out_t, b_out2)


@functools.partial(jax.jit, static_argnames=("tagset_size",))
def lstm_tagger(sentence, params, *, tagset_size):
    """Per-call wrapper: pad+flatten the sentence, launch the kernel, slice back.

    sentence: (T, B, E) f32 (time-major, nn.LSTM default)
    params:   output of prepare_lstm_tagger_params (pre-laid-out, per-model)
    """
    w_ih_t, w_hh_t, b, w_out_t, b_out2 = params
    seq_len, batch, embed = sentence.shape
    t_pad = w_out_t.shape[1]

    # Pad batch to the 8-sublane minimum, then flatten to (T*Bp, E) in XLA
    # (free HBM layout change) so the kernel never reshapes.
    b_pad = max(8, ((batch + 7) // 8) * 8)
    x = (
        jnp.zeros((seq_len, b_pad, embed), jnp.float32)
        .at[:, :batch, :]
        .set(sentence.astype(jnp.float32))
    )
    x_flat = x.reshape(seq_len * b_pad, embed)

    kernel = functools.partial(lstm_tagger_kernel, seq_len=seq_len, batch=b_pad)
    vmem = pl.BlockSpec(memory_space=pltpu.MemorySpace.VMEM)
    out = pl.pallas_call(
        kernel,
        out_shape=jax.ShapeDtypeStruct((b_pad, t_pad), jnp.float32),
        in_specs=[vmem] * 6,
        out_specs=vmem,
    )(x_flat, w_ih_t, w_hh_t, b, w_out_t, b_out2)

    return out[:batch, :tagset_size]


def _reference(sentence, w_ih, w_hh, b_ih, b_hh, w_out, b_out):
    """Pure-JAX reference matching PyTorch nn.LSTM + Linear + Sigmoid semantics."""
    seq_len, batch, _ = sentence.shape
    hidden = w_hh.shape[1]
    h = jnp.zeros((batch, hidden), jnp.float32)
    c = jnp.zeros((batch, hidden), jnp.float32)
    for t in range(seq_len):
        gates = sentence[t] @ w_ih.T + b_ih + h @ w_hh.T + b_hh
        i = jax.nn.sigmoid(gates[:, 0 * hidden:1 * hidden])
        f = jax.nn.sigmoid(gates[:, 1 * hidden:2 * hidden])
        g = jnp.tanh(gates[:, 2 * hidden:3 * hidden])
        o = jax.nn.sigmoid(gates[:, 3 * hidden:4 * hidden])
        c = f * c + i * g
        h = o * jnp.tanh(c)
    return jax.nn.sigmoid(h @ w_out.T + b_out)


if __name__ == "__main__":
    # Small, module-consistent shapes.
    embedding_dim = 16
    hidden_dim = 32
    tagset_size = 8
    seq_len = 8
    batch = 4

    key = jax.random.PRNGKey(0)
    ks = jax.random.split(key, 8)

    # Deterministic PyTorch-style init: U(-1/sqrt(H), 1/sqrt(H)).
    bound = 1.0 / jnp.sqrt(jnp.float32(hidden_dim))
    w_ih = jax.random.uniform(ks[0], (4 * hidden_dim, embedding_dim), jnp.float32, -bound, bound)
    w_hh = jax.random.uniform(ks[1], (4 * hidden_dim, hidden_dim), jnp.float32, -bound, bound)
    b_ih = jax.random.uniform(ks[2], (4 * hidden_dim,), jnp.float32, -bound, bound)
    b_hh = jax.random.uniform(ks[3], (4 * hidden_dim,), jnp.float32, -bound, bound)
    w_out = jax.random.uniform(ks[4], (tagset_size, hidden_dim), jnp.float32, -bound, bound)
    b_out = jax.random.uniform(ks[5], (tagset_size,), jnp.float32, -bound, bound)

    sentence = jax.random.normal(ks[6], (seq_len, batch, embedding_dim), jnp.float32)

    # One-time param layout prep (hoisted out of the per-call path).
    params = prepare_lstm_tagger_params(w_ih, w_hh, b_ih, b_hh, w_out, b_out)
    params = jax.tree_util.tree_map(jnp.asarray, params)

    tag_scores = lstm_tagger(sentence, params, tagset_size=tagset_size)
    tag_scores = jax.block_until_ready(tag_scores)

    ref = _reference(sentence, w_ih, w_hh, b_ih, b_hh, w_out, b_out)
    assert tag_scores.shape == (batch, tagset_size)
    # tanh-via-sigmoid introduces a few-ULP shift; tolerance relaxed accordingly.
    assert jnp.allclose(tag_scores, ref, atol=1e-4, rtol=1e-4)

    print("KERNEL_OK")
</pallas_src>

<mosaic_0001>
module attributes {stable_mosaic.version = 11 : i64} {
  func.func @lstm_tagger_kernel(%arg0: memref<64x16xf32, #tpu.memory_space<vmem>>, %arg1: memref<16x128xf32, #tpu.memory_space<vmem>>, %arg2: memref<32x128xf32, #tpu.memory_space<vmem>>, %arg3: memref<1x128xf32, #tpu.memory_space<vmem>>, %arg4: memref<32x128xf32, #tpu.memory_space<vmem>>, %arg5: memref<1x128xf32, #tpu.memory_space<vmem>>, %arg6: memref<8x128xf32, #tpu.memory_space<vmem>>) attributes {dimension_semantics = [], scalar_prefetch = 0 : i64, scratch_operands = 0 : i64, tpu.core_type = #tpu.core_type<tc>} {
    %c0 = arith.constant 0 : index
    %c0_0 = arith.constant 0 : index
    %0 = vector.load %arg0[%c0, %c0_0] : memref<64x16xf32, #tpu.memory_space<vmem>>, vector<64x16xf32>
    %c0_1 = arith.constant 0 : index
    %c0_2 = arith.constant 0 : index
    %1 = vector.load %arg1[%c0_1, %c0_2] : memref<16x128xf32, #tpu.memory_space<vmem>>, vector<16x128xf32>
    %cst = arith.constant dense<0.000000e+00> : vector<64x128xf32>
    %2 = tpu.matmul %0, %1, %cst {dimension_numbers = #tpu.dot_dimension_numbers<[1], [0], [0], [1], [0, 0, 1, 1], [], []>} : vector<64x16xf32>, vector<16x128xf32>, vector<64x128xf32> -> vector<64x128xf32>
    %c0_3 = arith.constant 0 : index
    %c0_4 = arith.constant 0 : index
    %3 = vector.load %arg3[%c0_3, %c0_4] : memref<1x128xf32, #tpu.memory_space<vmem>>, vector<1x128xf32>
    %4 = vector.broadcast %3 : vector<1x128xf32> to vector<64x128xf32>
    %5 = arith.addf %2, %4 : vector<64x128xf32>
    %c0_5 = arith.constant 0 : index
    %c0_6 = arith.constant 0 : index
    %6 = vector.load %arg2[%c0_5, %c0_6] : memref<32x128xf32, #tpu.memory_space<vmem>>, vector<32x128xf32>
    %cst_7 = arith.constant 0.000000e+00 : f32
    %7 = vector.broadcast %cst_7 : f32 to vector<8x32xf32>
    %cst_8 = arith.constant 0.000000e+00 : f32
    %8 = vector.broadcast %cst_8 : f32 to vector<8x32xf32>
    %9 = vector.extract_strided_slice %5 {offsets = [0, 0], sizes = [8, 128], strides = [1, 1]} : vector<64x128xf32> to vector<8x128xf32>
    %cst_9 = arith.constant dense<0.000000e+00> : vector<8x128xf32>
    %10 = tpu.matmul %7, %6, %cst_9 {dimension_numbers = #tpu.dot_dimension_numbers<[1], [0], [0], [1], [0, 0, 1, 1], [], []>} : vector<8x32xf32>, vector<32x128xf32>, vector<8x128xf32> -> vector<8x128xf32>
    %11 = arith.addf %9, %10 : vector<8x128xf32>
    %12 = arith.negf %11 : vector<8x128xf32>
    %13 = math.exp %12 : vector<8x128xf32>
    %cst_10 = arith.constant 1.000000e+00 : f32
    %14 = vector.broadcast %cst_10 : f32 to vector<8x128xf32>
    %15 = arith.addf %14, %13 : vector<8x128xf32>
    %16 = arith.divf %14, %15 : vector<8x128xf32>
    %17 = vector.extract_strided_slice %16 {offsets = [0, 0], sizes = [8, 32], strides = [1, 1]} : vector<8x128xf32> to vector<8x32xf32>
    %18 = vector.extract_strided_slice %16 {offsets = [0, 32], sizes = [8, 32], strides = [1, 1]} : vector<8x128xf32> to vector<8x32xf32>
    %19 = vector.extract_strided_slice %16 {offsets = [0, 64], sizes = [8, 32], strides = [1, 1]} : vector<8x128xf32> to vector<8x32xf32>
    %cst_11 = arith.constant 2.000000e+00 : f32
    %20 = vector.broadcast %cst_11 : f32 to vector<8x32xf32>
    %21 = arith.mulf %20, %19 : vector<8x32xf32>
    %cst_12 = arith.constant 1.000000e+00 : f32
    %22 = vector.broadcast %cst_12 : f32 to vector<8x32xf32>
    %23 = arith.subf %21, %22 : vector<8x32xf32>
    %24 = vector.extract_strided_slice %16 {offsets = [0, 96], sizes = [8, 32], strides = [1, 1]} : vector<8x128xf32> to vector<8x32xf32>
    %25 = arith.mulf %18, %8 : vector<8x32xf32>
    %26 = arith.mulf %17, %23 : vector<8x32xf32>
    %27 = arith.addf %25, %26 : vector<8x32xf32>
    %28 = math.tanh %27 : vector<8x32xf32>
    %29 = arith.mulf %24, %28 : vector<8x32xf32>
    %30 = vector.extract_strided_slice %5 {offsets = [8, 0], sizes = [8, 128], strides = [1, 1]} : vector<64x128xf32> to vector<8x128xf32>
    %cst_13 = arith.constant dense<0.000000e+00> : vector<8x128xf32>
    %31 = tpu.matmul %29, %6, %cst_13 {dimension_numbers = #tpu.dot_dimension_numbers<[1], [0], [0], [1], [0, 0, 1, 1], [], []>} : vector<8x32xf32>, vector<32x128xf32>, vector<8x128xf32> -> vector<8x128xf32>
    %32 = arith.addf %30, %31 : vector<8x128xf32>
    %33 = arith.negf %32 : vector<8x128xf32>
    %34 = math.exp %33 : vector<8x128xf32>
    %cst_14 = arith.constant 1.000000e+00 : f32
    %35 = vector.broadcast %cst_14 : f32 to vector<8x128xf32>
    %36 = arith.addf %35, %34 : vector<8x128xf32>
    %37 = arith.divf %35, %36 : vector<8x128xf32>
    %38 = vector.extract_strided_slice %37 {offsets = [0, 0], sizes = [8, 32], strides = [1, 1]} : vector<8x128xf32> to vector<8x32xf32>
    %39 = vector.extract_strided_slice %37 {offsets = [0, 32], sizes = [8, 32], strides = [1, 1]} : vector<8x128xf32> to vector<8x32xf32>
    %40 = vector.extract_strided_slice %37 {offsets = [0, 64], sizes = [8, 32], strides = [1, 1]} : vector<8x128xf32> to vector<8x32xf32>
    %cst_15 = arith.constant 2.000000e+00 : f32
    %41 = vector.broadcast %cst_15 : f32 to vector<8x32xf32>
    %42 = arith.mulf %41, %40 : vector<8x32xf32>
    %cst_16 = arith.constant 1.000000e+00 : f32
    %43 = vector.broadcast %cst_16 : f32 to vector<8x32xf32>
    %44 = arith.subf %42, %43 : vector<8x32xf32>
    %45 = vector.extract_strided_slice %37 {offsets = [0, 96], sizes = [8, 32], strides = [1, 1]} : vector<8x128xf32> to vector<8x32xf32>
    %46 = arith.mulf %39, %27 : vector<8x32xf32>
    %47 = arith.mulf %38, %44 : vector<8x32xf32>
    %48 = arith.addf %46, %47 : vector<8x32xf32>
    %49 = math.tanh %48 : vector<8x32xf32>
    %50 = arith.mulf %45, %49 : vector<8x32xf32>
    %51 = vector.extract_strided_slice %5 {offsets = [16, 0], sizes = [8, 128], strides = [1, 1]} : vector<64x128xf32> to vector<8x128xf32>
    %cst_17 = arith.constant dense<0.000000e+00> : vector<8x128xf32>
    %52 = tpu.matmul %50, %6, %cst_17 {dimension_numbers = #tpu.dot_dimension_numbers<[1], [0], [0], [1], [0, 0, 1, 1], [], []>} : vector<8x32xf32>, vector<32x128xf32>, vector<8x128xf32> -> vector<8x128xf32>
    %53 = arith.addf %51, %52 : vector<8x128xf32>
    %54 = arith.negf %53 : vector<8x128xf32>
    %55 = math.exp %54 : vector<8x128xf32>
    %cst_18 = arith.constant 1.000000e+00 : f32
    %56 = vector.broadcast %cst_18 : f32 to vector<8x128xf32>
    %57 = arith.addf %56, %55 : vector<8x128xf32>
    %58 = arith.divf %56, %57 : vector<8x128xf32>
    %59 = vector.extract_strided_slice %58 {offsets = [0, 0], sizes = [8, 32], strides = [1, 1]} : vector<8x128xf32> to vector<8x32xf32>
    %60 = vector.extract_strided_slice %58 {offsets = [0, 32], sizes = [8, 32], strides = [1, 1]} : vector<8x128xf32> to vector<8x32xf32>
    %61 = vector.extract_strided_slice %58 {offsets = [0, 64], sizes = [8, 32], strides = [1, 1]} : vector<8x128xf32> to vector<8x32xf32>
    %cst_19 = arith.constant 2.000000e+00 : f32
    %62 = vector.broadcast %cst_19 : f32 to vector<8x32xf32>
    %63 = arith.mulf %62, %61 : vector<8x32xf32>
    %cst_20 = arith.constant 1.000000e+00 : f32
    %64 = vector.broadcast %cst_20 : f32 to vector<8x32xf32>
    %65 = arith.subf %63, %64 : vector<8x32xf32>
    %66 = vector.extract_strided_slice %58 {offsets = [0, 96], sizes = [8, 32], strides = [1, 1]} : vector<8x128xf32> to vector<8x32xf32>
    %67 = arith.mulf %60, %48 : vector<8x32xf32>
    %68 = arith.mulf %59, %65 : vector<8x32xf32>
    %69 = arith.addf %67, %68 : vector<8x32xf32>
    %70 = math.tanh %69 : vector<8x32xf32>
    %71 = arith.mulf %66, %70 : vector<8x32xf32>
    %72 = vector.extract_strided_slice %5 {offsets = [24, 0], sizes = [8, 128], strides = [1, 1]} : vector<64x128xf32> to vector<8x128xf32>
    %cst_21 = arith.constant dense<0.000000e+00> : vector<8x128xf32>
    %73 = tpu.matmul %71, %6, %cst_21 {dimension_numbers = #tpu.dot_dimension_numbers<[1], [0], [0], [1], [0, 0, 1, 1], [], []>} : vector<8x32xf32>, vector<32x128xf32>, vector<8x128xf32> -> vector<8x128xf32>
    %74 = arith.addf %72, %73 : vector<8x128xf32>
    %75 = arith.negf %74 : vector<8x128xf32>
    %76 = math.exp %75 : vector<8x128xf32>
    %cst_22 = arith.constant 1.000000e+00 : f32
    %77 = vector.broadcast %cst_22 : f32 to vector<8x128xf32>
    %78 = arith.addf %77, %76 : vector<8x128xf32>
    %79 = arith.divf %77, %78 : vector<8x128xf32>
    %80 = vector.extract_strided_slice %79 {offsets = [0, 0], sizes = [8, 32], strides = [1, 1]} : vector<8x128xf32> to vector<8x32xf32>
    %81 = vector.extract_strided_slice %79 {offsets = [0, 32], sizes = [8, 32], strides = [1, 1]} : vector<8x128xf32> to vector<8x32xf32>
    %82 = vector.extract_strided_slice %79 {offsets = [0, 64], sizes = [8, 32], strides = [1, 1]} : vector<8x128xf32> to vector<8x32xf32>
    %cst_23 = arith.constant 2.000000e+00 : f32
    %83 = vector.broadcast %cst_23 : f32 to vector<8x32xf32>
    %84 = arith.mulf %83, %82 : vector<8x32xf32>
    %cst_24 = arith.constant 1.000000e+00 : f32
    %85 = vector.broadcast %cst_24 : f32 to vector<8x32xf32>
    %86 = arith.subf %84, %85 : vector<8x32xf32>
    %87 = vector.extract_strided_slice %79 {offsets = [0, 96], sizes = [8, 32], strides = [1, 1]} : vector<8x128xf32> to vector<8x32xf32>
    %88 = arith.mulf %81, %69 : vector<8x32xf32>
    %89 = arith.mulf %80, %86 : vector<8x32xf32>
    %90 = arith.addf %88, %89 : vector<8x32xf32>
    %91 = math.tanh %90 : vector<8x32xf32>
    %92 = arith.mulf %87, %91 : vector<8x32xf32>
    %93 = vector.extract_strided_slice %5 {offsets = [32, 0], sizes = [8, 128], strides = [1, 1]} : vector<64x128xf32> to vector<8x128xf32>
    %cst_25 = arith.constant dense<0.000000e+00> : vector<8x128xf32>
    %94 = tpu.matmul %92, %6, %cst_25 {dimension_numbers = #tpu.dot_dimension_numbers<[1], [0], [0], [1], [0, 0, 1, 1], [], []>} : vector<8x32xf32>, vector<32x128xf32>, vector<8x128xf32> -> vector<8x128xf32>
    %95 = arith.addf %93, %94 : vector<8x128xf32>
    %96 = arith.negf %95 : vector<8x128xf32>
    %97 = math.exp %96 : vector<8x128xf32>
    %cst_26 = arith.constant 1.000000e+00 : f32
    %98 = vector.broadcast %cst_26 : f32 to vector<8x128xf32>
    %99 = arith.addf %98, %97 : vector<8x128xf32>
    %100 = arith.divf %98, %99 : vector<8x128xf32>
    %101 = vector.extract_strided_slice %100 {offsets = [0, 0], sizes = [8, 32], strides = [1, 1]} : vector<8x128xf32> to vector<8x32xf32>
    %102 = vector.extract_strided_slice %100 {offsets = [0, 32], sizes = [8, 32], strides = [1, 1]} : vector<8x128xf32> to vector<8x32xf32>
    %103 = vector.extract_strided_slice %100 {offsets = [0, 64], sizes = [8, 32], strides = [1, 1]} : vector<8x128xf32> to vector<8x32xf32>
    %cst_27 = arith.constant 2.000000e+00 : f32
    %104 = vector.broadcast %cst_27 : f32 to vector<8x32xf32>
    %105 = arith.mulf %104, %103 : vector<8x32xf32>
    %cst_28 = arith.constant 1.000000e+00 : f32
    %106 = vector.broadcast %cst_28 : f32 to vector<8x32xf32>
    %107 = arith.subf %105, %106 : vector<8x32xf32>
    %108 = vector.extract_strided_slice %100 {offsets = [0, 96], sizes = [8, 32], strides = [1, 1]} : vector<8x128xf32> to vector<8x32xf32>
    %109 = arith.mulf %102, %90 : vector<8x32xf32>
    %110 = arith.mulf %101, %107 : vector<8x32xf32>
    %111 = arith.addf %109, %110 : vector<8x32xf32>
    %112 = math.tanh %111 : vector<8x32xf32>
    %113 = arith.mulf %108, %112 : vector<8x32xf32>
    %114 = vector.extract_strided_slice %5 {offsets = [40, 0], sizes = [8, 128], strides = [1, 1]} : vector<64x128xf32> to vector<8x128xf32>
    %cst_29 = arith.constant dense<0.000000e+00> : vector<8x128xf32>
    %115 = tpu.matmul %113, %6, %cst_29 {dimension_numbers = #tpu.dot_dimension_numbers<[1], [0], [0], [1], [0, 0, 1, 1], [], []>} : vector<8x32xf32>, vector<32x128xf32>, vector<8x128xf32> -> vector<8x128xf32>
    %116 = arith.addf %114, %115 : vector<8x128xf32>
    %117 = arith.negf %116 : vector<8x128xf32>
    %118 = math.exp %117 : vector<8x128xf32>
    %cst_30 = arith.constant 1.000000e+00 : f32
    %119 = vector.broadcast %cst_30 : f32 to vector<8x128xf32>
    %120 = arith.addf %119, %118 : vector<8x128xf32>
    %121 = arith.divf %119, %120 : vector<8x128xf32>
    %122 = vector.extract_strided_slice %121 {offsets = [0, 0], sizes = [8, 32], strides = [1, 1]} : vector<8x128xf32> to vector<8x32xf32>
    %123 = vector.extract_strided_slice %121 {offsets = [0, 32], sizes = [8, 32], strides = [1, 1]} : vector<8x128xf32> to vector<8x32xf32>
    %124 = vector.extract_strided_slice %121 {offsets = [0, 64], sizes = [8, 32], strides = [1, 1]} : vector<8x128xf32> to vector<8x32xf32>
    %cst_31 = arith.constant 2.000000e+00 : f32
    %125 = vector.broadcast %cst_31 : f32 to vector<8x32xf32>
    %126 = arith.mulf %125, %124 : vector<8x32xf32>
    %cst_32 = arith.constant 1.000000e+00 : f32
    %127 = vector.broadcast %cst_32 : f32 to vector<8x32xf32>
    %128 = arith.subf %126, %127 : vector<8x32xf32>
    %129 = vector.extract_strided_slice %121 {offsets = [0, 96], sizes = [8, 32], strides = [1, 1]} : vector<8x128xf32> to vector<8x32xf32>
    %130 = arith.mulf %123, %111 : vector<8x32xf32>
    %131 = arith.mulf %122, %128 : vector<8x32xf32>
    %132 = arith.addf %130, %131 : vector<8x32xf32>
    %133 = math.tanh %132 : vector<8x32xf32>
    %134 = arith.mulf %129, %133 : vector<8x32xf32>
    %135 = vector.extract_strided_slice %5 {offsets = [48, 0], sizes = [8, 128], strides = [1, 1]} : vector<64x128xf32> to vector<8x128xf32>
    %cst_33 = arith.constant dense<0.000000e+00> : vector<8x128xf32>
    %136 = tpu.matmul %134, %6, %cst_33 {dimension_numbers = #tpu.dot_dimension_numbers<[1], [0], [0], [1], [0, 0, 1, 1], [], []>} : vector<8x32xf32>, vector<32x128xf32>, vector<8x128xf32> -> vector<8x128xf32>
    %137 = arith.addf %135, %136 : vector<8x128xf32>
    %138 = arith.negf %137 : vector<8x128xf32>
    %139 = math.exp %138 : vector<8x128xf32>
    %cst_34 = arith.constant 1.000000e+00 : f32
    %140 = vector.broadcast %cst_34 : f32 to vector<8x128xf32>
    %141 = arith.addf %140, %139 : vector<8x128xf32>
    %142 = arith.divf %140, %141 : vector<8x128xf32>
    %143 = vector.extract_strided_slice %142 {offsets = [0, 0], sizes = [8, 32], strides = [1, 1]} : vector<8x128xf32> to vector<8x32xf32>
    %144 = vector.extract_strided_slice %142 {offsets = [0, 32], sizes = [8, 32], strides = [1, 1]} : vector<8x128xf32> to vector<8x32xf32>
    %145 = vector.extract_strided_slice %142 {offsets = [0, 64], sizes = [8, 32], strides = [1, 1]} : vector<8x128xf32> to vector<8x32xf32>
    %cst_35 = arith.constant 2.000000e+00 : f32
    %146 = vector.broadcast %cst_35 : f32 to vector<8x32xf32>
    %147 = arith.mulf %146, %145 : vector<8x32xf32>
    %cst_36 = arith.constant 1.000000e+00 : f32
    %148 = vector.broadcast %cst_36 : f32 to vector<8x32xf32>
    %149 = arith.subf %147, %148 : vector<8x32xf32>
    %150 = vector.extract_strided_slice %142 {offsets = [0, 96], sizes = [8, 32], strides = [1, 1]} : vector<8x128xf32> to vector<8x32xf32>
    %151 = arith.mulf %144, %132 : vector<8x32xf32>
    %152 = arith.mulf %143, %149 : vector<8x32xf32>
    %153 = arith.addf %151, %152 : vector<8x32xf32>
    %154 = math.tanh %153 : vector<8x32xf32>
    %155 = arith.mulf %150, %154 : vector<8x32xf32>
    %156 = vector.extract_strided_slice %5 {offsets = [56, 0], sizes = [8, 128], strides = [1, 1]} : vector<64x128xf32> to vector<8x128xf32>
    %cst_37 = arith.constant dense<0.000000e+00> : vector<8x128xf32>
    %157 = tpu.matmul %155, %6, %cst_37 {dimension_numbers = #tpu.dot_dimension_numbers<[1], [0], [0], [1], [0, 0, 1, 1], [], []>} : vector<8x32xf32>, vector<32x128xf32>, vector<8x128xf32> -> vector<8x128xf32>
    %158 = arith.addf %156, %157 : vector<8x128xf32>
    %159 = arith.negf %158 : vector<8x128xf32>
    %160 = math.exp %159 : vector<8x128xf32>
    %cst_38 = arith.constant 1.000000e+00 : f32
    %161 = vector.broadcast %cst_38 : f32 to vector<8x128xf32>
    %162 = arith.addf %161, %160 : vector<8x128xf32>
    %163 = arith.divf %161, %162 : vector<8x128xf32>
    %164 = vector.extract_strided_slice %163 {offsets = [0, 0], sizes = [8, 32], strides = [1, 1]} : vector<8x128xf32> to vector<8x32xf32>
    %165 = vector.extract_strided_slice %163 {offsets = [0, 32], sizes = [8, 32], strides = [1, 1]} : vector<8x128xf32> to vector<8x32xf32>
    %166 = vector.extract_strided_slice %163 {offsets = [0, 64], sizes = [8, 32], strides = [1, 1]} : vector<8x128xf32> to vector<8x32xf32>
    %cst_39 = arith.constant 2.000000e+00 : f32
    %167 = vector.broadcast %cst_39 : f32 to vector<8x32xf32>
    %168 = arith.mulf %167, %166 : vector<8x32xf32>
    %cst_40 = arith.constant 1.000000e+00 : f32
    %169 = vector.broadcast %cst_40 : f32 to vector<8x32xf32>
    %170 = arith.subf %168, %169 : vector<8x32xf32>
    %171 = vector.extract_strided_slice %163 {offsets = [0, 96], sizes = [8, 32], strides = [1, 1]} : vector<8x128xf32> to vector<8x32xf32>
    %172 = arith.mulf %165, %153 : vector<8x32xf32>
    %173 = arith.mulf %164, %170 : vector<8x32xf32>
    %174 = arith.addf %172, %173 : vector<8x32xf32>
    %175 = math.tanh %174 : vector<8x32xf32>
    %176 = arith.mulf %171, %175 : vector<8x32xf32>
    %c0_41 = arith.constant 0 : index
    %c0_42 = arith.constant 0 : index
    %177 = vector.load %arg4[%c0_41, %c0_42] : memref<32x128xf32, #tpu.memory_space<vmem>>, vector<32x128xf32>
    %cst_43 = arith.constant dense<0.000000e+00> : vector<8x128xf32>
    %178 = tpu.matmul %176, %177, %cst_43 {dimension_numbers = #tpu.dot_dimension_numbers<[1], [0], [0], [1], [0, 0, 1, 1], [], []>} : vector<8x32xf32>, vector<32x128xf32>, vector<8x128xf32> -> vector<8x128xf32>
    %c0_44 = arith.constant 0 : index
    %c0_45 = arith.constant 0 : index
    %179 = vector.load %arg5[%c0_44, %c0_45] : memref<1x128xf32, #tpu.memory_space<vmem>>, vector<1x128xf32>
    %180 = vector.broadcast %179 : vector<1x128xf32> to vector<8x128xf32>
    %181 = arith.addf %178, %180 : vector<8x128xf32>
    %182 = arith.negf %181 : vector<8x128xf32>
    %183 = math.exp %182 : vector<8x128xf32>
    %cst_46 = arith.constant 1.000000e+00 : f32
    %184 = vector.broadcast %cst_46 : f32 to vector<8x128xf32>
    %185 = arith.addf %184, %183 : vector<8x128xf32>
    %186 = arith.divf %184, %185 : vector<8x128xf32>
    %c0_47 = arith.constant 0 : index
    %c0_48 = arith.constant 0 : index
    %187 = vector.load %arg6[%c0_47, %c0_48] : memref<8x128xf32, #tpu.memory_space<vmem>>, vector<8x128xf32>
    tpu.vector_store %arg6[%c0_47, %c0_48], %186 {strides = array<i32>} : memref<8x128xf32, #tpu.memory_space<vmem>>, vector<8x128xf32>,
    return
  }
}

</mosaic_0001>

<bundles_post_ra>
// kernel: lstm_tagger.1
= control target key start
LH: loop header
LB: loop body
LE: loop exit
PB: predicated region body
PF: predicated region fallthrough
CT: control target
= control target key end

     0   :  { %v1339_v0 = vmov 0.0   ;;  %vm1340_vm0 = vmmov 0   ;;  %vm40_vm1 = vcmask 130048   ;;  %s1341_s13 = smov 64   ;;  %vm174_vm2 = vcmask 261120   ;;  %s1606_s1 = inlined_call_operand.vmem [shape: f32[16,128], index: 1, kind: input, shape index: {}]   ;;  %s1607_s2 = inlined_call_operand.vmem [shape: f32[32,128], index: 2, kind: input, shape index: {}]   ;;  %s1608_s0 = inlined_call_operand.vmem [shape: f32[64,16], index: 0, kind: input, shape index: {}]   ;;  %s1609_s3 = inlined_call_operand.vmem [shape: f32[1,128], index: 3, kind: input, shape index: {}]   ;;  %s1610_s4 = inlined_call_operand.vmem [shape: f32[32,128], index: 4, kind: input, shape index: {}]   ;;  %s1611_s5 = inlined_call_operand.vmem [shape: f32[1,128], index: 5, kind: input, shape index: {}]   ;;  %s1612_s6 = inlined_call_operand.vmem [shape: f32[8,128], index: 6, kind: output, shape index: {}]  }
   0x1   :  { %1184 = vmatprep.subr.mxu1 %v1339_v0  ;;  %v32_v1 = vld [vmem:[%s1606_s1 + $0x8] sm:$0xff]  ;;  %v1385_v2 = vld [vmem:[%s1607_s2 + $0x18] sm:$0xff]  ;;  %v31_v3 = vld [vmem:[%s1606_s1] sm:$0xff]  ;;  %1192 = vmatprep.mubr.msk.f32.mxu1 %vm1340_vm0, %v1339_v0 }
   0x2   :  { %1168 = vmatprep.subr.mxu0 %v32_v1  ;;  %1185 = vmatpush3.msra.mxu1 %v1385_v2  ;;  %v1396_v4 = vld [vmem:[%s1607_s2 + $0x10] sm:$0xff]  ;;  %v23_v5 = vld [vmem:[%s1608_s0] sm:$0xff]  ;;  %v24_v6 = vld [vmem:[%s1608_s0 + $0x8] sm:$0xff] }
   0x3   :  { %1169 = vmatpush3.msra.mxu0 %v32_v1  ;;  %1186 = vmatprep.subr.mxu1 %v1339_v0  ;;  %v1409_v7 = vld [vmem:[%s1607_s2 + $0x8] sm:$0xff]  ;;  %v1417_v8 = vld [vmem:[%s1607_s2] sm:$0xff]  ;;  %v25_v46 = vld [vmem:[%s1608_s0 + $0x10] sm:$0xff] }
   0x4   :  { %1170 = vmatprep.subr.mxu0 %v31_v3  ;;  %1187 = vmatpush3.msra.mxu1 %v1396_v4  ;;  %v1446_v10 = vld [vmem:[%s1609_s3] ss:$0 sm:$0xff]  ;;  %s1342_s3 = smov 32   ;;  %v26_v47 = vld [vmem:[%s1608_s0 + $0x18] sm:$0xff]  ;;  %v28_v49 = vld [vmem:[%s1608_s0 + $0x28] sm:$0xff] }
   0x5   :  { %1171 = vmatpush3.msra.mxu0 %v31_v3  ;;  %1172 = vmatprep.mubr.msk.f32.mxu0 %vm40_vm1, %v23_v5  ;;  %v27_v48 = vld [vmem:[%s1608_s0 + $0x20] sm:$0xff]  ;;  %v29_v50 = vld [vmem:[%s1608_s0 + $0x30] sm:$0xff]  ;;  %v30_v51 = vld [vmem:[%s1608_s0 + $0x38] sm:$0xff] }
   0x6   :  { %1188 = vmatprep.subr.mxu1 %v1339_v0  ;;  %1173 = vmatmul.mubr.msk.f32.vlgmr.msra.gmra.mxu0 %vm40_vm1, %v24_v6 }
   0x7   :  { %1189 = vmatpush3.msra.mxu1 %v1409_v7  ;;  %1206 = vmatprep.subr.mxu0 %v1339_v0 }
   0x8   :  { %1190 = vmatprep.subr.mxu1 %v1339_v0  ;;  %1207 = vmatpush3.msra.mxu0 %v1385_v2 }
   0x9   :  { %1191 = vmatpush3.msra.mxu1 %v1417_v8  ;;  %1208 = vmatprep.subr.mxu0 %v1339_v0 }
   0xa   :  { %1193 = vmatmul.mubr.f32.vlgmr.msra.gmra.mxu1 %v1339_v0  ;;  %1195 = vmatprep.subr.mxu1 %v1339_v0 }
   0xb   :  { %1196 = vmatpush3.msra.mxu1 %v1385_v2  ;;  %1203 = vmatprep.mubr.msk.f32.mxu1 %vm1340_vm0, %v1339_v0 }
   0xc   :  { %1197 = vmatprep.subr.mxu1 %v1339_v0  ;;  %1209 = vmatpush3.msra.mxu0 %v1396_v4 }
   0xd   :  { %1198 = vmatpush3.msra.mxu1 %v1396_v4  ;;  %1210 = vmatprep.subr.mxu0 %v1339_v0 }
   0xe   :  { %1199 = vmatprep.subr.mxu1 %v1339_v0  ;;  %1211 = vmatpush3.msra.mxu0 %v1409_v7 }
   0xf   :  { %1200 = vmatpush3.msra.mxu1 %v1409_v7  ;;  %1212 = vmatprep.subr.mxu0 %v1339_v0 }
  0x10   :  { %1201 = vmatprep.subr.mxu1 %v1339_v0  ;;  %1213 = vmatpush3.msra.mxu0 %v1417_v8 }
  0x11   :  { %1202 = vmatpush3.msra.mxu1 %v1417_v8  ;;  %1228 = vmatprep.subr.mxu0 %v1339_v0 }
  0x12   :  { %1217 = vmatprep.subr.mxu1 %v1339_v0  ;;  %1175 = vmatprep.mubr.msk.f32.mxu0 %vm40_vm1, %v25_v46 }
  0x13   :  { %1176 = vmatmul.mubr.msk.f32.gmra.mxu0 %vm40_vm1, %v26_v47 }
  0x14   :  { %1178 = vmatprep.mubr.msk.f32.mxu0 %vm40_vm1, %v27_v48 }
  0x17   :  { %1179 = vmatmul.mubr.msk.f32.gmra.mxu0 %vm40_vm1, %v28_v49 }
  0x18   :  { %1181 = vmatprep.mubr.msk.f32.mxu0 %vm40_vm1, %v29_v50 }
  0x1b   :  { %1182 = vmatmul.mubr.msk.f32.gmra.mxu0 %vm40_vm1, %v30_v51 }
  0x1c   :  { %1214 = vmatprep.mubr.msk.f32.mxu0 %vm1340_vm0, %v1339_v0 }
  0xc6   :  { %v1174_v9 = vpop.f32.mrf.mxu0 }
  0xc7   :  { %v137_v31 = vadd.f32 %v1174_v9, %v1446_v10 }
  0xc8   :  { %v131_v11 = vpop.f32.mrf.mxu0 }
  0xc9   :  { %v132_v12 = vadd.f32 %v1446_v10, %v131_v11 }
  0xca   :  { %v244_v13 = vpop.f32.mrf.mxu1 }
  0xcb   :  { %v248_v14 = vadd.f32 %v244_v13, %v132_v12 }
  0xcc   :  { %v1194_v15 = vpop.f32.mrf.mxu1 }
  0xcd   :  { %v1087_v16 = vmul.f32 -1.442695, %v248_v14 }
  0xcf   :  { %1287 = vpow2.f32 %v1087_v16 }
  0xd3   :  { %v1177_v56 = vpop.f32.mrf.mxu0 }
  0xd5   :  { %v141_v57 = vpop.f32.mrf.mxu0 }
  0xd6   :  { %v142_v62 = vadd.f32 %v1446_v10, %v141_v57 }
  0xd7   :  { %v1506_v58 = vpop.f32.mrf.mxu0 }
  0xd9   :  { %v1508_v59 = vpop.f32.mrf.mxu0 }
  0xdb   :  { %v1510_v60 = vpop.f32.mrf.mxu0 }
  0xdc   :  { %v1288_v17 = vpop.eup %1287 }
  0xdd   :  { %v252_v18 = vadd.f32 1.0, %v1288_v17  ;;  %v1512_v61 = vpop.f32.mrf.mxu0 }
  0xdf   :  { %1289 = vrcp.f32 %v252_v18 }
  0xec   :  { %v1290_v19 = vpop.eup %1289 }
  0xed   :  { %v255_v20 = vmul.f32 2.0, %v1290_v19  ;;  %v257_v24 = vmul.f32 0.0, %v1290_v19 }
  0xef   :  { %v1088_v21 = vadd.f32 -1.0, %v255_v20 }
  0xf1   :  { %259 = vrot.lane.b32.xlu0 %v1088_v21, %s1341_s13 }
 0x163   :  { %v260_v22 = vpop.permute.xlu0 %259 }
 0x164   :  { %v262_v23 = vmul.f32 %v1290_v19, %v260_v22 }
 0x166   :  { %264 = vrot.lane.b32.xlu0 %v262_v23, %s1342_s3  ;;  %v147_v23 = vadd.f32 %v1177_v56, %v1446_v10 }
 0x1d8   :  { %v265_v25 = vpop.permute.xlu0 %264 }
 0x1d9   :  { %v267_v26 = vadd.f32 %v265_v25, %v257_v24 }
 0x1db   :  { %1291 = vtanh.f32 %v267_v26 }
 0x1e8   :  { %v1292_v27 = vpop.eup %1291 }
 0x1e9   :  { %270 = vrot.lane.b32.xlu1 %v1292_v27, %s1341_s13 }
 0x25b   :  { %v271_v28 = vpop.permute.xlu1 %270 }
 0x25c   :  { %v273_v29 = vmul.f32 %v1290_v19, %v271_v28 }
 0x25e   :  { %275 = vrot.lane.b32.xlu1 %v273_v29, %s1342_s3 }
 0x2d0   :  { %v276_v30 = vpop.permute.xlu1 %275 }
 0x2d1   :  { %1204 = vmatmul.mubr.msk.f32.vlgmr.msra.gmra.mxu1 %vm174_vm2, %v276_v30 }
 0x2d2   :  { %1218 = vmatpush3.msra.mxu1 %v1385_v2  ;;  %1225 = vmatprep.mubr.msk.f32.mxu1 %vm1340_vm0, %v1339_v0 }
 0x2d3   :  { %1219 = vmatprep.subr.mxu1 %v1339_v0 }
 0x2d4   :  { %1220 = vmatpush3.msra.mxu1 %v1396_v4 }
 0x2d5   :  { %1221 = vmatprep.subr.mxu1 %v1339_v0 }
 0x2d6   :  { %1222 = vmatpush3.msra.mxu1 %v1409_v7 }
 0x2d7   :  { %1223 = vmatprep.subr.mxu1 %v1339_v0 }
 0x2d8   :  { %1224 = vmatpush3.msra.mxu1 %v1417_v8 }
 0x2d9   :  { %1239 = vmatprep.subr.mxu1 %v1339_v0 }
 0x391   :  { %v345_v32 = vpop.f32.mrf.mxu1 }
 0x392   :  { %v349_v33 = vadd.f32 %v345_v32, %v137_v31 }
 0x393   :  { %v1205_v34 = vpop.f32.mrf.mxu1 }
 0x394   :  { %v1090_v35 = vmul.f32 -1.442695, %v349_v33 }
 0x396   :  { %1293 = vpow2.f32 %v1090_v35 }
 0x3a3   :  { %v1294_v36 = vpop.eup %1293 }
 0x3a4   :  { %v353_v37 = vadd.f32 1.0, %v1294_v36 }
 0x3a6   :  { %1295 = vrcp.f32 %v353_v37 }
 0x3b3   :  { %v1296_v38 = vpop.eup %1295 }
 0x3b4   :  { %v356_v39 = vmul.f32 2.0, %v1296_v38  ;;  %v358_v43 = vmul.f32 %v1296_v38, %v267_v26 }
 0x3b6   :  { %v1091_v40 = vadd.f32 -1.0, %v356_v39 }
 0x3b8   :  { %360 = vrot.lane.b32.xlu0 %v1091_v40, %s1341_s13 }
 0x42a   :  { %v361_v41 = vpop.permute.xlu0 %360 }
 0x42b   :  { %v363_v42 = vmul.f32 %v1296_v38, %v361_v41 }
 0x42d   :  { %365 = vrot.lane.b32.xlu1 %v363_v42, %s1342_s3  ;;  %v152_v42 = vadd.f32 %v1446_v10, %v1508_v59 }
 0x49f   :  { %v366_v44 = vpop.permute.xlu1 %365 }
 0x4a0   :  { %v368_v45 = vadd.f32 %v366_v44, %v358_v43 }
 0x4a2   :  { %1297 = vtanh.f32 %v368_v45 }
 0x4af   :  { %v1298_v52 = vpop.eup %1297 }
 0x4b0   :  { %371 = vrot.lane.b32.xlu0 %v1298_v52, %s1341_s13 }
 0x522   :  { %v372_v53 = vpop.permute.xlu0 %371 }
 0x523   :  { %v374_v54 = vmul.f32 %v1296_v38, %v372_v53 }
 0x525   :  { %376 = vrot.lane.b32.xlu1 %v374_v54, %s1342_s3 }
 0x597   :  { %v377_v55 = vpop.permute.xlu1 %376 }
 0x598   :  { %1215 = vmatmul.mubr.msk.f32.vlgmr.msra.gmra.mxu0 %vm174_vm2, %v377_v55 }
 0x599   :  { %1229 = vmatpush3.msra.mxu0 %v1385_v2  ;;  %1236 = vmatprep.mubr.msk.f32.mxu0 %vm1340_vm0, %v1339_v0 }
 0x59a   :  { %1230 = vmatprep.subr.mxu0 %v1339_v0 }
 0x59b   :  { %1231 = vmatpush3.msra.mxu0 %v1396_v4 }
 0x59c   :  { %1232 = vmatprep.subr.mxu0 %v1339_v0 }
 0x59d   :  { %1233 = vmatpush3.msra.mxu0 %v1409_v7 }
 0x59e   :  { %1234 = vmatprep.subr.mxu0 %v1339_v0 }
 0x59f   :  { %1235 = vmatpush3.msra.mxu0 %v1417_v8 }
 0x5a0   :  { %1250 = vmatprep.subr.mxu0 %v1339_v0 }
 0x658   :  { %v446_v63 = vpop.f32.mrf.mxu0 }
 0x659   :  { %v450_v1 = vadd.f32 %v446_v63, %v142_v62 }
 0x65a   :  { %v1216_v3 = vpop.f32.mrf.mxu0 }
 0x65b   :  { %v1093_v5 = vmul.f32 -1.442695, %v450_v1  ;;  %v157_v1 = vadd.f32 %v1506_v58, %v1446_v10 }
 0x65d   :  { %1299 = vpow2.f32 %v1093_v5 }
 0x66a   :  { %v1300_v6 = vpop.eup %1299 }
 0x66b   :  { %v454_v9 = vadd.f32 1.0, %v1300_v6 }
 0x66d   :  { %1301 = vrcp.f32 %v454_v9 }
 0x67a   :  { %v1302_v11 = vpop.eup %1301 }
 0x67b   :  { %v457_v12 = vmul.f32 2.0, %v1302_v11  ;;  %v459_v16 = vmul.f32 %v1302_v11, %v368_v45 }
 0x67d   :  { %v1094_v13 = vadd.f32 -1.0, %v457_v12 }
 0x67f   :  { %461 = vrot.lane.b32.xlu0 %v1094_v13, %s1341_s13 }
 0x6f1   :  { %v462_v14 = vpop.permute.xlu0 %461 }
 0x6f2   :  { %v464_v15 = vmul.f32 %v1302_v11, %v462_v14 }
 0x6f4   :  { %466 = vrot.lane.b32.xlu1 %v464_v15, %s1342_s3 }
 0x766   :  { %v467_v17 = vpop.permute.xlu1 %466 }
 0x767   :  { %v469_v18 = vadd.f32 %v467_v17, %v459_v16 }
 0x769   :  { %1303 = vtanh.f32 %v469_v18 }
 0x776   :  { %v1304_v19 = vpop.eup %1303 }
 0x777   :  { %472 = vrot.lane.b32.xlu0 %v1304_v19, %s1341_s13 }
 0x7e9   :  { %v473_v20 = vpop.permute.xlu0 %472 }
 0x7ea   :  { %v475_v21 = vmul.f32 %v1302_v11, %v473_v20  ;;  %v162_v20 = vadd.f32 %v1446_v10, %v1512_v61 }
 0x7ec   :  { %477 = vrot.lane.b32.xlu1 %v475_v21, %s1342_s3 }
 0x85e   :  { %v478_v22 = vpop.permute.xlu1 %477 }
 0x85f   :  { %1226 = vmatmul.mubr.msk.f32.vlgmr.msra.gmra.mxu1 %vm174_vm2, %v478_v22 }
 0x860   :  { %1240 = vmatpush3.msra.mxu1 %v1385_v2  ;;  %1247 = vmatprep.mubr.msk.f32.mxu1 %vm1340_vm0, %v1339_v0 }
 0x861   :  { %1241 = vmatprep.subr.mxu1 %v1339_v0 }
 0x862   :  { %1242 = vmatpush3.msra.mxu1 %v1396_v4 }
 0x863   :  { %1243 = vmatprep.subr.mxu1 %v1339_v0 }
 0x864   :  { %1244 = vmatpush3.msra.mxu1 %v1409_v7 }
 0x865   :  { %1245 = vmatprep.subr.mxu1 %v1339_v0 }
 0x866   :  { %1246 = vmatpush3.msra.mxu1 %v1417_v8 }
 0x867   :  { %1261 = vmatprep.subr.mxu1 %v1339_v0 }
 0x91f   :  { %v547_v24 = vpop.f32.mrf.mxu1 }
 0x920   :  { %v551_v25 = vadd.f32 %v547_v24, %v147_v23 }
 0x921   :  { %v1227_v26 = vpop.f32.mrf.mxu1 }
 0x922   :  { %v1096_v27 = vmul.f32 -1.442695, %v551_v25 }
 0x924   :  { %1305 = vpow2.f32 %v1096_v27 }
 0x931   :  { %v1306_v28 = vpop.eup %1305 }
 0x932   :  { %v555_v29 = vadd.f32 1.0, %v1306_v28 }
 0x934   :  { %1307 = vrcp.f32 %v555_v29 }
 0x941   :  { %v1308_v30 = vpop.eup %1307 }
 0x942   :  { %v558_v31 = vmul.f32 2.0, %v1308_v30  ;;  %v560_v35 = vmul.f32 %v1308_v30, %v469_v18 }
 0x944   :  { %v1097_v32 = vadd.f32 -1.0, %v558_v31 }
 0x946   :  { %562 = vrot.lane.b32.xlu0 %v1097_v32, %s1341_s13 }
 0x9b8   :  { %v563_v33 = vpop.permute.xlu0 %562 }
 0x9b9   :  { %v565_v34 = vmul.f32 %v1308_v30, %v563_v33 }
 0x9bb   :  { %567 = vrot.lane.b32.xlu1 %v565_v34, %s1342_s3 }
 0xa2d   :  { %v568_v36 = vpop.permute.xlu1 %567 }
 0xa2e   :  { %v570_v37 = vadd.f32 %v568_v36, %v560_v35 }
 0xa30   :  { %1309 = vtanh.f32 %v570_v37 }
 0xa3d   :  { %v1310_v38 = vpop.eup %1309 }
 0xa3e   :  { %573 = vrot.lane.b32.xlu0 %v1310_v38, %s1341_s13  ;;  %v167_v38 = vadd.f32 %v1510_v60, %v1446_v10  ;;  %v984_v60 = vld [vmem:[%s1610_s4 + $0x18] sm:$0xff] }
 0xab0   :  { %v574_v39 = vpop.permute.xlu0 %573 }
 0xab1   :  { %v576_v40 = vmul.f32 %v1308_v30, %v574_v39 }
 0xab3   :  { %578 = vrot.lane.b32.xlu1 %v576_v40, %s1342_s3 }
 0xb25   :  { %v579_v41 = vpop.permute.xlu1 %578 }
 0xb26   :  { %1237 = vmatmul.mubr.msk.f32.vlgmr.msra.gmra.mxu0 %vm174_vm2, %v579_v41 }
 0xb27   :  { %1251 = vmatpush3.msra.mxu0 %v1385_v2  ;;  %1258 = vmatprep.mubr.msk.f32.mxu0 %vm1340_vm0, %v1339_v0 }
 0xb28   :  { %1252 = vmatprep.subr.mxu0 %v1339_v0 }
 0xb29   :  { %1253 = vmatpush3.msra.mxu0 %v1396_v4 }
 0xb2a   :  { %1254 = vmatprep.subr.mxu0 %v1339_v0 }
 0xb2b   :  { %1255 = vmatpush3.msra.mxu0 %v1409_v7 }
 0xb2c   :  { %1256 = vmatprep.subr.mxu0 %v1339_v0 }
 0xb2d   :  { %1257 = vmatpush3.msra.mxu0 %v1417_v8 }
 0xb2e   :  { %1272 = vmatprep.subr.mxu0 %v1339_v0 }
 0xbe6   :  { %v648_v43 = vpop.f32.mrf.mxu0 }
 0xbe7   :  { %v652_v44 = vadd.f32 %v648_v43, %v152_v42 }
 0xbe8   :  { %v1238_v45 = vpop.f32.mrf.mxu0 }
 0xbe9   :  { %v1099_v46 = vmul.f32 -1.442695, %v652_v44 }
 0xbeb   :  { %1311 = vpow2.f32 %v1099_v46 }
 0xbf8   :  { %v1312_v47 = vpop.eup %1311 }
 0xbf9   :  { %v656_v48 = vadd.f32 1.0, %v1312_v47 }
 0xbfb   :  { %1313 = vrcp.f32 %v656_v48 }
 0xc08   :  { %v1314_v49 = vpop.eup %1313 }
 0xc09   :  { %v659_v50 = vmul.f32 2.0, %v1314_v49  ;;  %v661_v54 = vmul.f32 %v1314_v49, %v570_v37 }
 0xc0b   :  { %v1100_v51 = vadd.f32 -1.0, %v659_v50 }
 0xc0d   :  { %663 = vrot.lane.b32.xlu0 %v1100_v51, %s1341_s13 }
 0xc7f   :  { %v664_v52 = vpop.permute.xlu0 %663 }
 0xc80   :  { %v666_v53 = vmul.f32 %v1314_v49, %v664_v52  ;;  %v983_v52 = vld [vmem:[%s1610_s4 + $0x10] sm:$0xff] }
 0xc82   :  { %668 = vrot.lane.b32.xlu1 %v666_v53, %s1342_s3  ;;  %v982_v53 = vld [vmem:[%s1610_s4 + $0x8] sm:$0xff] }
 0xcf4   :  { %v669_v55 = vpop.permute.xlu1 %668 }
 0xcf5   :  { %v671_v56 = vadd.f32 %v669_v55, %v661_v54  ;;  %v981_v54 = vld [vmem:[%s1610_s4] sm:$0xff] }
 0xcf7   :  { %1315 = vtanh.f32 %v671_v56 }
 0xd04   :  { %v1316_v57 = vpop.eup %1315 }
 0xd05   :  { %674 = vrot.lane.b32.xlu0 %v1316_v57, %s1341_s13 }
 0xd77   :  { %v675_v59 = vpop.permute.xlu0 %674 }
 0xd78   :  { %v677_v62 = vmul.f32 %v1314_v49, %v675_v59 }
 0xd7a   :  { %679 = vrot.lane.b32.xlu1 %v677_v62, %s1342_s3  ;;  %v1110_v62 = vld [vmem:[%s1611_s5] ss:$0 sm:$0xff] }
 0xdec   :  { %v680_v63 = vpop.permute.xlu1 %679 }
 0xded   :  { %1248 = vmatmul.mubr.msk.f32.vlgmr.msra.gmra.mxu1 %vm174_vm2, %v680_v63 }
 0xdee   :  { %1262 = vmatpush3.msra.mxu1 %v1385_v2  ;;  %1269 = vmatprep.mubr.msk.f32.mxu1 %vm1340_vm0, %v1339_v0 }
 0xdef   :  { %1263 = vmatprep.subr.mxu1 %v1339_v0 }
 0xdf0   :  { %1264 = vmatpush3.msra.mxu1 %v1396_v4 }
 0xdf1   :  { %1265 = vmatprep.subr.mxu1 %v1339_v0 }
 0xdf2   :  { %1266 = vmatpush3.msra.mxu1 %v1409_v7 }
 0xdf3   :  { %1267 = vmatprep.subr.mxu1 %v1339_v0 }
 0xdf4   :  { %1268 = vmatpush3.msra.mxu1 %v1417_v8 }
 0xead   :  { %v749_v3 = vpop.f32.mrf.mxu1 }
 0xeae   :  { %v753_v2 = vadd.f32 %v749_v3, %v157_v1 }
 0xeaf   :  { %v1249_v5 = vpop.f32.mrf.mxu1 }
 0xeb0   :  { %v1102_v6 = vmul.f32 -1.442695, %v753_v2 }
 0xeb2   :  { %1317 = vpow2.f32 %v1102_v6 }
 0xebf   :  { %v1318_v9 = vpop.eup %1317 }
 0xec0   :  { %v757_v11 = vadd.f32 1.0, %v1318_v9 }
 0xec2   :  { %1319 = vrcp.f32 %v757_v11 }
 0xecf   :  { %v1320_v4 = vpop.eup %1319 }
 0xed0   :  { %v760_v12 = vmul.f32 2.0, %v1320_v4  ;;  %v762_v8 = vmul.f32 %v1320_v4, %v671_v56 }
 0xed2   :  { %v1103_v13 = vadd.f32 -1.0, %v760_v12 }
 0xed4   :  { %764 = vrot.lane.b32.xlu0 %v1103_v13, %s1341_s13 }
 0xf46   :  { %v765_v7 = vpop.permute.xlu0 %764 }
 0xf47   :  { %v767_v14 = vmul.f32 %v1320_v4, %v765_v7 }
 0xf49   :  { %769 = vrot.lane.b32.xlu1 %v767_v14, %s1342_s3 }
 0xfbb   :  { %v770_v15 = vpop.permute.xlu1 %769 }
 0xfbc   :  { %v772_v58 = vadd.f32 %v770_v15, %v762_v8 }
 0xfbe   :  { %1321 = vtanh.f32 %v772_v58 }
 0xfcb   :  { %v1322_v16 = vpop.eup %1321 }
 0xfcc   :  { %775 = vrot.lane.b32.xlu0 %v1322_v16, %s1341_s13 }
0x103e   :  { %v776_v17 = vpop.permute.xlu0 %775 }
0x103f   :  { %v778_v18 = vmul.f32 %v1320_v4, %v776_v17 }
0x1041   :  { %780 = vrot.lane.b32.xlu1 %v778_v18, %s1342_s3 }
0x10b3   :  { %v781_v19 = vpop.permute.xlu1 %780 }
0x10b4   :  { %1259 = vmatmul.mubr.msk.f32.vlgmr.msra.gmra.mxu0 %vm174_vm2, %v781_v19 }
0x10b5   :  { %1280 = vmatprep.mubr.msk.f32.mxu0 %vm1340_vm0, %v1339_v0  ;;  %1273 = vmatpush3.msra.mxu0 %v984_v60 }
0x10b6   :  { %1274 = vmatprep.subr.mxu0 %v1339_v0 }
0x10b7   :  { %1275 = vmatpush3.msra.mxu0 %v983_v52 }
0x10b8   :  { %1276 = vmatprep.subr.mxu0 %v1339_v0 }
0x10b9   :  { %1277 = vmatpush3.msra.mxu0 %v982_v53 }
0x10ba   :  { %1278 = vmatprep.subr.mxu0 %v1339_v0 }
0x10bb   :  { %1279 = vmatpush3.msra.mxu0 %v981_v54 }
0x1174   :  { %v850_v21 = vpop.f32.mrf.mxu0 }
0x1175   :  { %v854_v22 = vadd.f32 %v850_v21, %v162_v20 }
0x1176   :  { %v1260_v23 = vpop.f32.mrf.mxu0 }
0x1177   :  { %v1105_v24 = vmul.f32 -1.442695, %v854_v22 }
0x1179   :  { %1323 = vpow2.f32 %v1105_v24 }
0x1186   :  { %v1324_v25 = vpop.eup %1323 }
0x1187   :  { %v858_v26 = vadd.f32 1.0, %v1324_v25 }
0x1189   :  { %1325 = vrcp.f32 %v858_v26 }
0x1196   :  { %v1326_v27 = vpop.eup %1325 }
0x1197   :  { %v861_v28 = vmul.f32 2.0, %v1326_v27  ;;  %v863_v32 = vmul.f32 %v1326_v27, %v772_v58 }
0x1199   :  { %v1106_v29 = vadd.f32 -1.0, %v861_v28 }
0x119b   :  { %865 = vrot.lane.b32.xlu0 %v1106_v29, %s1341_s13 }
0x120d   :  { %v866_v30 = vpop.permute.xlu0 %865 }
0x120e   :  { %v868_v31 = vmul.f32 %v1326_v27, %v866_v30 }
0x1210   :  { %870 = vrot.lane.b32.xlu1 %v868_v31, %s1342_s3 }
0x1282   :  { %v871_v33 = vpop.permute.xlu1 %870 }
0x1283   :  { %v873_v61 = vadd.f32 %v871_v33, %v863_v32 }
0x1285   :  { %1327 = vtanh.f32 %v873_v61 }
0x1292   :  { %v1328_v34 = vpop.eup %1327 }
0x1293   :  { %876 = vrot.lane.b32.xlu0 %v1328_v34, %s1341_s13 }
0x1305   :  { %v877_v35 = vpop.permute.xlu0 %876 }
0x1306   :  { %v879_v36 = vmul.f32 %v1326_v27, %v877_v35 }
0x1308   :  { %881 = vrot.lane.b32.xlu1 %v879_v36, %s1342_s3 }
0x137a   :  { %v882_v37 = vpop.permute.xlu1 %881 }
0x137b   :  { %1270 = vmatmul.mubr.msk.f32.vlgmr.msra.gmra.mxu1 %vm174_vm2, %v882_v37 }
0x143b   :  { %v951_v39 = vpop.f32.mrf.mxu1 }
0x143c   :  { %v955_v40 = vadd.f32 %v951_v39, %v167_v38 }
0x143d   :  { %v1271_v41 = vpop.f32.mrf.mxu1 }
0x143e   :  { %v1108_v42 = vmul.f32 -1.442695, %v955_v40 }
0x1440   :  { %1329 = vpow2.f32 %v1108_v42 }
0x144d   :  { %v1330_v43 = vpop.eup %1329 }
0x144e   :  { %v959_v44 = vadd.f32 1.0, %v1330_v43 }
0x1450   :  { %1331 = vrcp.f32 %v959_v44 }
0x145d   :  { %v1332_v45 = vpop.eup %1331 }
0x145e   :  { %v962_v46 = vmul.f32 2.0, %v1332_v45  ;;  %v964_v50 = vmul.f32 %v1332_v45, %v873_v61 }
0x1460   :  { %v1109_v47 = vadd.f32 -1.0, %v962_v46 }
0x1462   :  { %966 = vrot.lane.b32.xlu0 %v1109_v47, %s1341_s13 }
0x14d4   :  { %v967_v48 = vpop.permute.xlu0 %966 }
0x14d5   :  { %v969_v49 = vmul.f32 %v1332_v45, %v967_v48 }
0x14d7   :  { %971 = vrot.lane.b32.xlu1 %v969_v49, %s1342_s3 }
0x1549   :  { %v972_v51 = vpop.permute.xlu1 %971 }
0x154a   :  { %v974_v10 = vadd.f32 %v972_v51, %v964_v50 }
0x154c   :  { %1333 = vtanh.f32 %v974_v10 }
0x1559   :  { %v1334_v55 = vpop.eup %1333 }
0x155a   :  { %977 = vrot.lane.b32.xlu0 %v1334_v55, %s1341_s13 }
0x15cc   :  { %v978_v56 = vpop.permute.xlu0 %977 }
0x15cd   :  { %v980_v57 = vmul.f32 %v1332_v45, %v978_v56 }
0x15cf   :  { %993 = vrot.lane.b32.xlu1 %v980_v57, %s1342_s3 }
0x1641   :  { %v994_v59 = vpop.permute.xlu1 %993 }
0x1642   :  { %1281 = vmatmul.mubr.msk.f32.vlgmr.msra.gmra.mxu0 %vm174_vm2, %v994_v59 }
0x1702   :  { %v1063_v63 = vpop.f32.mrf.mxu0 }
0x1703   :  { %v1064_v1 = vadd.f32 %v1110_v62, %v1063_v63 }
0x1704   :  { %v1282_v3 = vpop.f32.mrf.mxu0 }
0x1705   :  { %v1112_v2 = vmul.f32 -1.442695, %v1064_v1 }
0x1707   :  { %1335 = vpow2.f32 %v1112_v2 }
0x1714   :  { %v1336_v0 = vpop.eup %1335 }
0x1715   :  { %v1070_v5 = vadd.f32 1.0, %v1336_v0 }
0x1717   :  { %1337 = vrcp.f32 %v1070_v5 }
0x1724   :  { %v1338_v6 = vpop.eup %1337 }
0x1725   :  { %1073 = vst [vmem:[%s1612_s6] sm:$0xff] %v1338_v6 }

</bundles_post_ra>
